<compile_context>
chip_gen: v7x
topology: tpu7x:2x2x1
jax: 0.10.0
libtpu: 0.0.40
codegen_flags: <defaults>
</compile_context>

<pallas_src>
import functools

import jax
import jax.numpy as jnp
from jax.experimental import pallas as pl
from jax.experimental.pallas import tpu as pltpu


# ----------------------------- small helpers ------------------------------


def _round_up(v, m):
    return ((v + m - 1) // m) * m


def _cdiv(a, b):
    return -(-a // b)


def _device_kind():
    try:
        return jax.devices()[0].device_kind.lower()
    except Exception:
        return ""


def _vmem_capacity_bytes():
    # Per-TensorCore VMEM: 128 MiB on v5e/v6e, 64 MiB on v7x.
    try:
        return int(pltpu.get_tpu_info().vmem_capacity_bytes)
    except Exception:
        return 64 << 20  # conservative (v7x)


def _has_native_narrow_valu():
    # v5e and earlier have no bf16 VALUs: narrow elementwise decomposes into
    # unpack -> f32 mul -> repack, so prefer the plain f32 path there.
    kind = _device_kind()
    return not any(tok in kind for tok in ("v2", "v3", "v4", "v5"))


def _min_grid_steps():
    # v7x has 2 TensorCores per chip: make sure the "parallel" row axis has
    # enough steps to feed both.  Single-TC chips (v5e/v6e) don't need this.
    return 8 if "v7" in _device_kind() else 1


# ------------------------------- kernels ----------------------------------


def _rmsnorm_kernel(x_ref, w_ref, o_ref, *, eps, inv_hidden, narrow_native):
    # x_ref: (tr, hidden), w_ref: (1, hidden), o_ref: (tr, hidden)
    x = x_ref[...]
    xf = x.astype(jnp.float32)
    # Exact f32 sum of squares over the fully-resident hidden axis (XLU).
    ss = jnp.sum(xf * xf, axis=-1, keepdims=True) * inv_hidden   # (tr, 1)
    inv = jax.lax.rsqrt(ss + eps)                                # EUP
    if narrow_native and o_ref.dtype != jnp.float32:
        # Chip has native narrow VALUs: keep the wide elementwise product in
        # the narrow dtype (weight was pre-cast in the wrapper).
        out = (x * inv.astype(x.dtype)) * w_ref[...]
    else:
        out = xf * inv * w_ref[...]   # weight pre-cast to f32 in the wrapper
    o_ref[...] = out.astype(o_ref.dtype)


def _sumsq_kernel(x_ref, ss_ref, *, hidden, th):
    # Two-pass fallback, pass A: accumulate sum(x^2) over hidden chunks into
    # the resident (per-row-block) output.
    j = pl.program_id(1)

    @pl.when(j == 0)
    def _():
        ss_ref[...] = jnp.zeros_like(ss_ref)

    xf = x_ref[...].astype(jnp.float32)
    # The last hidden chunk may read past the array extent; zero those lanes
    # so they do not pollute the reduction.
    col = j * th + jax.lax.broadcasted_iota(jnp.int32, xf.shape, 1)
    xf = jnp.where(col < hidden, xf, 0.0)
    ss_ref[...] += jnp.sum(xf * xf, axis=-1, keepdims=True)


def _scale_kernel(x_ref, ss_ref, w_ref, o_ref, *, eps, inv_hidden, narrow_native):
    # Two-pass fallback, pass B: rescale one hidden chunk.
    inv = jax.lax.rsqrt(ss_ref[...] * inv_hidden + eps)          # (tr, 1)
    x = x_ref[...]
    if narrow_native and o_ref.dtype != jnp.float32:
        out = (x * inv.astype(x.dtype)) * w_ref[...]
    else:
        out = x.astype(jnp.float32) * inv * w_ref[...]
    o_ref[...] = out.astype(o_ref.dtype)


# ------------------------------- wrappers ----------------------------------


def _rmsnorm_two_pass(x2d, w2d, rows, hidden, eps, narrow_native, *,
                      sublane, itemsize, vmem_cap, max_hidden_chunk=None):
    """Fallback for very wide hidden: hidden axis is tiled (two passes)."""
    hidden_p = _round_up(hidden, 128)

    # Small sublane-aligned row tile; lane (hidden) chunk carries the bytes.
    tr = min(4 * sublane, _round_up(rows, sublane))
    tr = max(sublane, (tr // sublane) * sublane)

    target_block_bytes = 4 << 20
    th = max(128, (target_block_bytes // (tr * itemsize)) // 128 * 128)
    th = min(th, hidden_p)
    if max_hidden_chunk is not None:
        th = min(th, max(128, (max_hidden_chunk // 128) * 128))

    grid = (pl.cdiv(rows, tr), pl.cdiv(hidden, th))

    block_bytes = tr * th * itemsize
    vmem_limit = int(min(vmem_cap, max(32 << 20, 4 * block_bytes + (8 << 20))))

    # Pass A: per-row sum of squares, accumulated across hidden chunks.
    ss = pl.pallas_call(
        functools.partial(_sumsq_kernel, hidden=hidden, th=th),
        out_shape=jax.ShapeDtypeStruct((rows, 1), jnp.float32),
        grid_spec=pltpu.PrefetchScalarGridSpec(
            num_scalar_prefetch=0,
            grid=grid,
            in_specs=[pl.BlockSpec((tr, th), lambda i, j: (i, j))],
            out_specs=pl.BlockSpec((tr, 1), lambda i, j: (i, 0)),
        ),
        compiler_params=pltpu.CompilerParams(
            dimension_semantics=("parallel", "arbitrary"),
            vmem_limit_bytes=vmem_limit,
        ),
    )(x2d)

    # Pass B: rescale each hidden chunk with the per-row inverse norm.
    out2d = pl.pallas_call(
        functools.partial(_scale_kernel, eps=eps, inv_hidden=1.0 / hidden,
                          narrow_native=narrow_native),
        out_shape=jax.ShapeDtypeStruct((rows, hidden), x2d.dtype),
        grid_spec=pltpu.PrefetchScalarGridSpec(
            num_scalar_prefetch=0,
            grid=grid,
            in_specs=[
                pl.BlockSpec((tr, th), lambda i, j: (i, j)),
                pl.BlockSpec((tr, 1), lambda i, j: (i, 0)),
                pl.BlockSpec((1, th), lambda i, j: (0, j)),
            ],
            out_specs=pl.BlockSpec((tr, th), lambda i, j: (i, j)),
        ),
        compiler_params=pltpu.CompilerParams(
            dimension_semantics=("parallel", "parallel"),
            vmem_limit_bytes=vmem_limit,
        ),
    )(x2d, ss, w2d)

    return out2d


def rmsnorm(x, weight, eps=1e-5, *, _force_two_pass=False, _max_hidden_chunk=None):
    """x: (..., hidden), weight: (hidden,). Returns same shape/dtype as x."""
    orig_shape = x.shape
    hidden = orig_shape[-1]
    rows = 1
    for d in orig_shape[:-1]:
        rows *= d

    itemsize = jnp.dtype(x.dtype).itemsize
    sublane = {4: 8, 2: 16, 1: 32}.get(itemsize, 8)
    hidden_p = _round_up(hidden, 128)   # physical lane padding (sizing only)

    narrow_native = (jnp.dtype(x.dtype) != jnp.dtype(jnp.float32)
                     and _has_native_narrow_valu())
    w_dtype = x.dtype if narrow_native else jnp.float32
    w2d = weight.astype(w_dtype).reshape(1, hidden)   # tiny one-off XLA cast
    x2d = x.reshape(rows, hidden)                     # collapse: no data copy

    vmem_cap = _vmem_capacity_bytes()
    # Throughput plateaus once blocks are a few MiB: cap the pipelined
    # footprint well under v7x's 64 MiB VMEM and leave headroom for scratch.
    footprint_budget = min(28 << 20, max(16 << 20, vmem_cap // 2))
    min_steps = _min_grid_steps()

    # -------- fallback: hidden too wide to keep fully resident --------
    if _force_two_pass or (4 * sublane * hidden_p * itemsize > footprint_budget):
        out2d = _rmsnorm_two_pass(
            x2d, w2d, rows, hidden, eps, narrow_native,
            sublane=sublane, itemsize=itemsize, vmem_cap=vmem_cap,
            max_hidden_chunk=_max_hidden_chunk)
        return out2d.reshape(orig_shape)

    # -------- single pass: hidden fully resident on the lane axis --------
    row_bytes = hidden_p * itemsize
    target_block_bytes = min(8 << 20, footprint_budget // 4)  # (in+out) x 2 bufs
    tr = max(sublane, target_block_bytes // row_bytes)
    tr = min(tr, _round_up(rows, sublane))
    if min_steps > 1:
        # Keep >= min_steps grid steps so both v7x TensorCores get work.
        tr = min(tr, _round_up(_cdiv(rows, min_steps), sublane))
    tr = max(sublane, (tr // sublane) * sublane)

    grid = (pl.cdiv(rows, tr),)   # partial last block is masked on writeback

    w_itemsize = jnp.dtype(w_dtype).itemsize
    pipeline_bytes = (2 * 2 * tr * hidden_p * itemsize          # x + out, 2 bufs
                      + 2 * 8 * hidden_p * w_itemsize)          # weight tile
    vmem_limit = int(min(vmem_cap, max(32 << 20, pipeline_bytes + (4 << 20))))

    out2d = pl.pallas_call(
        functools.partial(_rmsnorm_kernel, eps=eps, inv_hidden=1.0 / hidden,
                          narrow_native=narrow_native),
        out_shape=jax.ShapeDtypeStruct((rows, hidden), x.dtype),
        grid_spec=pltpu.PrefetchScalarGridSpec(
            num_scalar_prefetch=0,
            grid=grid,
            in_specs=[
                pl.BlockSpec((tr, hidden), lambda i: (i, 0)),
                pl.BlockSpec((1, hidden), lambda i: (0, 0)),
            ],
            out_specs=pl.BlockSpec((tr, hidden), lambda i: (i, 0)),
        ),
        compiler_params=pltpu.CompilerParams(
            dimension_semantics=("parallel",),
            vmem_limit_bytes=vmem_limit,
        ),
    )(x2d, w2d)

    return out2d.reshape(orig_shape)


def _reference_rmsnorm(x, weight, eps=1e-5):
    xf = x.astype(jnp.float32)
    ms = jnp.mean(xf * xf, axis=-1, keepdims=True)
    return (xf * jax.lax.rsqrt(ms + eps) * weight.astype(jnp.float32)).astype(x.dtype)


if __name__ == "__main__":
    key = jax.random.PRNGKey(0)
    batch, seq, hidden = 2, 8, 32

    x = jax.random.normal(key, (batch, seq, hidden), dtype=jnp.float32)
    # Module init is ones; perturb slightly so the elementwise scale is exercised.
    weight = jnp.ones((hidden,), dtype=jnp.float32) + 0.01 * jnp.arange(
        hidden, dtype=jnp.float32)

    out = jax.block_until_ready(rmsnorm(x, weight, eps=1e-5))
    ref = _reference_rmsnorm(x, weight, eps=1e-5)
    assert out.shape == x.shape and out.dtype == x.dtype
    assert jnp.allclose(out, ref, atol=1e-5, rtol=1e-5)

    # Narrow-dtype path (bf16): native product on v6e/v7x, f32 product on v5e.
    xb = x.astype(jnp.bfloat16)
    wb = weight.astype(jnp.bfloat16)
    outb = jax.block_until_ready(rmsnorm(xb, wb, eps=1e-5))
    refb = _reference_rmsnorm(xb, wb, eps=1e-5)
    assert outb.shape == xb.shape and outb.dtype == xb.dtype
    assert jnp.allclose(outb.astype(jnp.float32), refb.astype(jnp.float32),
                        atol=5e-2, rtol=5e-2)

    # Exercise the hidden-tiled two-pass fallback at a small forced shape
    # (hidden = 320 -> three 128-wide chunks, last one partial).
    h2 = 320
    x2 = jax.random.normal(jax.random.PRNGKey(1), (4, 8, h2), dtype=jnp.float32)
    w2 = jnp.ones((h2,), dtype=jnp.float32) + 0.001 * jnp.arange(
        h2, dtype=jnp.float32)
    out2 = jax.block_until_ready(
        rmsnorm(x2, w2, eps=1e-5, _force_two_pass=True, _max_hidden_chunk=128))
    ref2 = _reference_rmsnorm(x2, w2, eps=1e-5)
    assert out2.shape == x2.shape
    assert jnp.allclose(out2, ref2, atol=1e-5, rtol=1e-5)

    print("KERNEL_OK")
</pallas_src>

<mosaic_0001>
module attributes {stable_mosaic.version = 11 : i64} {
  func.func @_rmsnorm_kernel(%arg0: i32, %arg1: memref<16x32xf32, #tpu.memory_space<vmem>>, %arg2: memref<1x32xf32, #tpu.memory_space<vmem>>, %arg3: memref<16x32xf32, #tpu.memory_space<vmem>>) attributes {dimension_semantics = [#tpu.dimension_semantics<parallel>], iteration_bounds = array<i64: 1>, scalar_prefetch = 0 : i64, scratch_operands = 0 : i64, tpu.core_type = #tpu.core_type<tc>, window_params = [{transform_indices = @transform_0, window_bounds = array<i64: 16, 32>}, {pipeline_mode = #tpu.pipeline_mode<synchronous>, transform_indices = @transform_1, window_bounds = array<i64: 1, 32>}, {transform_indices = @transform_2, window_bounds = array<i64: 16, 32>}]} {
    %c0 = arith.constant 0 : index
    %c0_0 = arith.constant 0 : index
    %0 = vector.load %arg1[%c0, %c0_0] : memref<16x32xf32, #tpu.memory_space<vmem>>, vector<16x32xf32>
    %1 = arith.mulf %0, %0 : vector<16x32xf32>
    %cst = arith.constant dense<0.000000e+00> : vector<16xf32>
    %2 = vector.multi_reduction <add>, %1, %cst [1] : vector<16x32xf32> to vector<16xf32>
    %3 = vector.shape_cast %2 : vector<16xf32> to vector<16x1xf32>
    %cst_1 = arith.constant 3.125000e-02 : f32
    %4 = vector.broadcast %cst_1 : f32 to vector<16x1xf32>
    %5 = arith.mulf %3, %4 : vector<16x1xf32>
    %cst_2 = arith.constant 9.99999974E-6 : f32
    %6 = vector.broadcast %cst_2 : f32 to vector<16x1xf32>
    %7 = arith.addf %5, %6 : vector<16x1xf32>
    %8 = math.rsqrt %7 : vector<16x1xf32>
    %9 = vector.broadcast %8 : vector<16x1xf32> to vector<16x32xf32>
    %10 = arith.mulf %0, %9 : vector<16x32xf32>
    %c0_3 = arith.constant 0 : index
    %c0_4 = arith.constant 0 : index
    %11 = vector.load %arg2[%c0_3, %c0_4] : memref<1x32xf32, #tpu.memory_space<vmem>>, vector<1x32xf32>
    %12 = vector.broadcast %11 : vector<1x32xf32> to vector<16x32xf32>
    %13 = arith.mulf %10, %12 : vector<16x32xf32>
    %c0_5 = arith.constant 0 : index
    %c0_6 = arith.constant 0 : index
    %14 = vector.load %arg3[%c0_5, %c0_6] : memref<16x32xf32, #tpu.memory_space<vmem>>, vector<16x32xf32>
    tpu.vector_store %arg3[%c0_5, %c0_6], %13 {strides = array<i32>} : memref<16x32xf32, #tpu.memory_space<vmem>>, vector<16x32xf32>,
    return
  }
  func.func @transform_0(%arg0: i32) -> (i32, i32) {
    %c0_i32 = arith.constant 0 : i32
    %c0_i32_0 = arith.constant 0 : i32
    return %arg0, %c0_i32 : i32, i32
  }
  func.func @transform_1(%arg0: i32) -> (i32, i32) {
    %c0_i32 = arith.constant 0 : i32
    %c0_i32_0 = arith.constant 0 : i32
    %c0_i32_1 = arith.constant 0 : i32
    return %c0_i32, %c0_i32_0 : i32, i32
  }
  func.func @transform_2(%arg0: i32) -> (i32, i32) {
    %c0_i32 = arith.constant 0 : i32
    %c0_i32_0 = arith.constant 0 : i32
    return %arg0, %c0_i32 : i32, i32
  }
}

</mosaic_0001>

<bundles_post_ra>
// kernel: tpu_custom_call.1
= control target key start
LH: loop header
LB: loop body
LE: loop exit
PB: predicated region body
PF: predicated region fallthrough
CT: control target
= control target key end

     0   :  { %7 = vsyncpa [#allocation3], 0  ;;  %s186_s0 = inlined_call_operand.hbm [shape: f32[16,32], index: 0, kind: input, shape index: {}]   ;;  %s187_s1 = inlined_call_operand.vmem [shape: f32[1,32], index: 1, kind: input, shape index: {}]   ;;  %s188_s2 = inlined_call_operand.hbm [shape: f32[16,32], index: 2, kind: output, shape index: {}]  }
   0x1   :  { %8 = vsyncpa [#allocation4], 0  ;;  %s130_s9 = smov [#allocation2]   ;;  %s82_s13 = scalar_lea.hbm %s186_s0, 256 }
   0x2   :  { %s14_s10 = sshll.u32 %s130_s9, 4  ;;  %p83_p0 = scmp.ne.s32.totalorder %s186_s0, %s82_s13  ;;  %s15_s10 = int_to_ptr.vmem [resolvable:$true] %s14_s10 }
   0x3   :  { %p86_p1 = scmp.lt.u32.totalorder %s82_s13, %s186_s0 }
   0x5   :  { %p88_p2 = pnand %p86_p1, %p83_p0 }
   0x7   :  { %91 = shalt.err (!%p88_p2)
}
   0x8   :  { %s92_s18 = scalar_lea.vmem %s15_s10, 256  ;;  %p97_p4 = scmp.lt.s32.totalorder %s15_s10, %s15_s10 }
   0x9   :  { %p93_p3 = scmp.ne.s32.totalorder %s15_s10, %s92_s18  ;;  %p98_p5 = scmp.lt.s32.totalorder %s92_s18, %s92_s18 }
   0xb   :  { %p99_p6 = por %p98_p5, %p97_p4 }
   0xd   :  { %p100_p7 = pnand %p99_p6, %p93_p3 }
   0xf   :  { %103 = shalt.err (!%p100_p7)
}
  0x10   :  { %s131_s19 = smov 128   ;;  %s132_s20 = smov 8  }
  0x11   :  { %20 = dma.hbm_to_vmem [thread:$0]  %s186_s0, 256, %s15_s10, [#allocation3], %s131_s19, %s131_s19, %s132_s20  }
  0x12   :  { %126 = dma.done.wait [#allocation3], 256  }
  0x13   :  { %127 = vsyncadd [#allocation3], 4294967040  ;;  %v26_v0 = vld [vmem:[#allocation2] sm:$0xff]  ;;  %vm30_vm0 = vcmask 261120   ;;  %v27_v1 = vld [vmem:[#allocation2 + $0x8] sm:$0xff]  ;;  %s133_s24 = smov [#allocation5]  }
  0x14   :  { %v28_v2 = vmul.f32 %v26_v0, %v26_v0  ;;  %v29_v3 = vmul.f32 %v27_v1, %v27_v1  ;;  %v73_v13 = vld [vmem:[%s187_s1] ss:$0 sm:$0xff]  ;;  %s61_s25 = sshll.u32 %s133_s24, 4  ;;  %s62_s25 = int_to_ptr.vmem [resolvable:$true] %s61_s25 }
  0x15   :  { %s104_s26 = scalar_lea.vmem %s62_s25, 256  ;;  %p109_p9 = scmp.lt.s32.totalorder %s62_s25, %s62_s25 }
  0x16   :  { %v31_v4 = vsel %vm30_vm0, %v28_v2, 0.0  ;;  %v34_v5 = vsel %vm30_vm0, %v29_v3, 0.0  ;;  %p105_p8 = scmp.ne.s32.totalorder %s62_s25, %s104_s26  ;;  %p110_p10 = scmp.lt.s32.totalorder %s104_s26, %s104_s26 }
  0x17   :  { %32 = vadd.xlane.f32.xlu0 %v31_v4 }
  0x18   :  { %p111_p11 = por %p110_p10, %p109_p9 }
  0x1a   :  { %p112_p12 = pnand %p111_p11, %p105_p8 }
  0x1b   :  { %35 = vadd.xlane.f32.xlu0 %v34_v5 }
  0xa4   :  { %v33_v6 = vpop.xlane.xlu0 %32 }
  0xa5   :  { %v37_v7 = vmul.f32 0.03125, %v33_v6 }
  0xa7   :  { %v39_v8 = vadd.f32 1e-05, %v37_v7 }
  0xa8   :  { %v36_v9 = vpop.xlane.xlu0 %35 }
  0xa9   :  { %78 = vrsqrt.f32 %v39_v8  ;;  %v38_v10 = vmul.f32 0.03125, %v36_v9 }
  0xab   :  { %v40_v11 = vadd.f32 1e-05, %v38_v10 }
  0xad   :  { %80 = vrsqrt.f32 %v40_v11 }
  0xb3   :  { %v79_v12 = vpop.eup %78 }
  0xb4   :  { %v43_v14 = vmul.f32 %v79_v12, %v26_v0 }
  0xb6   :  { %v52_v15 = vmul.f32 %v73_v13, %v43_v14 }
  0xb7   :  { %v81_v16 = vpop.eup %80 }
  0xb8   :  { %v44_v17 = vmul.f32 %v81_v16, %v27_v1  ;;  %54 = vst.msk [vmem:[#allocation5] sm:$0xff] %vm30_vm0, %v52_v15 }
  0xba   :  { %v53_v18 = vmul.f32 %v73_v13, %v44_v17 }
  0xbc   :  { %55 = vst.msk [vmem:[#allocation5 + $0x8] sm:$0xff] %vm30_vm0, %v53_v18 }
  0xbd   :  { %115 = shalt.err (!%p112_p12)
}
  0xbe   :  { %s116_s28 = scalar_lea.hbm %s188_s2, 256 }
  0xbf   :  { %p117_p13 = scmp.ne.s32.totalorder %s188_s2, %s116_s28  ;;  %p120_p0 = scmp.lt.u32.totalorder %s116_s28, %s188_s2 }
  0xc1   :  { %p122_p1 = pnand %p120_p0, %p117_p13 }
  0xc3   :  { %125 = shalt.err (!%p122_p1)
}
  0xc4   :  { %67 = dma.vmem_to_hbm [thread:$0]  %s62_s25, 256, %s188_s2, [#allocation4], %s131_s19, %s131_s19, %s132_s20  }
  0xc5   :  { %128 = dma.done.wait [#allocation4], 256  }
  0xc6   :  { %129 = vsyncadd [#allocation4], 4294967040 }
  0xc7   :  { %71 = vsyncpa [#allocation3], 1 }
  0xc8   :  { %72 = vsyncpa [#allocation4], 1 }

</bundles_post_ra>
